<compile_context>
chip_gen: v5e
topology: v5e:2x2
jax: 0.10.0
libtpu: 0.0.40
codegen_flags: <defaults>
</compile_context>

<pallas_src>
import math

import jax
import jax.numpy as jnp
from jax.experimental import pallas as pl
from jax.experimental.pallas import tpu as pltpu


def _layer_scale_kernel(x_ref, gamma_ref, o_ref):
    # Pure VPU elementwise multiply; gamma tile (1, C) broadcasts over rows.
    g = gamma_ref[...]                          # already in the compute dtype
    o_ref[...] = (x_ref[...].astype(g.dtype) * g).astype(o_ref.dtype)


def _default_block_bytes() -> int:
    """Per-generation combined (in + out) bytes per block."""
    try:
        kind = jax.devices()[0].device_kind.lower()
    except Exception:
        kind = ""
    if "v6" in kind:
        return 14 * 1024 * 1024   # 128 MiB VMEM: large blocks amortize per-step overhead
    if "v5 lite" in kind or "v5e" in kind:
        return 6 * 1024 * 1024    # stay comfortable inside v5e's scoped VMEM
    return 8 * 1024 * 1024        # v7x (64 MiB VMEM per TC) and unknown chips


def layer_scale(x: jax.Array, gamma: jax.Array, *,
                out_dtype=None,
                target_block_bytes: int | None = None) -> jax.Array:
    """Apply LayerScale: x * gamma, gamma broadcast over the last axis of x.

    out_dtype: None -> strict PyTorch promotion (jnp.result_type(x, gamma)).
               Pass jnp.bfloat16 explicitly to keep a bf16 output with fp32 gamma.
    """
    orig_shape = x.shape
    dim = orig_shape[-1]
    assert gamma.shape == (dim,), f"gamma must be ({dim},), got {gamma.shape}"
    assert jnp.issubdtype(x.dtype, jnp.floating), "layer_scale supports float dtypes only"
    assert jnp.issubdtype(gamma.dtype, jnp.floating), "gamma must be a float dtype"

    rows = 1
    for s in orig_shape[:-1]:
        rows *= s

    if out_dtype is None:
        out_dtype = jnp.result_type(x.dtype, gamma.dtype)   # PyTorch promotion
    out_dtype = jnp.dtype(out_dtype)

    in_bytes = jnp.dtype(x.dtype).itemsize
    out_bytes = out_dtype.itemsize
    bytes_per_elem = in_bytes + out_bytes

    # Compute dtype: stay in bf16 when everything is bf16, fp32 otherwise.
    if (x.dtype == jnp.bfloat16 and gamma.dtype == jnp.bfloat16
            and out_dtype == jnp.bfloat16):
        compute_dtype = jnp.bfloat16
    else:
        compute_dtype = jnp.float32

    if target_block_bytes is None:
        target_block_bytes = _default_block_bytes()

    # --- Lane-dense packing only when dim < 128 (masked stores below 128 lanes
    #     are the expensive case).  Otherwise run directly on (rows, dim) with
    #     zero wrapper-side padding or copies.
    if dim < 128:
        k = 128 // math.gcd(dim, 128)
    else:
        k = 1
    packed_dim = k * dim
    packed_rows = pl.cdiv(rows, k)

    # --- Dtype-aware sublane alignment for row tiles (8 f32 / 16 bf16).
    sublane = 32 // min(in_bytes, out_bytes)

    # --- Lane tiling: full width if an (sublane, packed_dim) sliver fits the
    #     budget; otherwise 128-multiple chunks (keeps huge dim within VMEM).
    if packed_dim <= 128 or sublane * packed_dim * bytes_per_elem <= target_block_bytes:
        lane_tile = packed_dim
    else:
        lane_tile = (target_block_bytes // (sublane * bytes_per_elem)) // 128 * 128
        lane_tile = max(128, min(lane_tile, (packed_dim // 128) * 128))
    n_lane = pl.cdiv(packed_dim, lane_tile)

    # --- VMEM-budgeted, sublane-aligned row tile (never larger than the array).
    if packed_rows <= sublane:
        row_tile = packed_rows                        # full-extent block (always legal)
    else:
        row_tile = max(sublane, target_block_bytes // (lane_tile * bytes_per_elem))
        row_tile = (row_tile // sublane) * sublane
        row_tile = min(row_tile, (packed_rows // sublane) * sublane)
        if n_lane == 1 and packed_rows > 4 * sublane:
            # Keep >= 4 grid steps so v7x's two TensorCores both get work
            # (harmless on the single-TC v5e/v6e).
            cap = pl.cdiv(pl.cdiv(packed_rows, 4), sublane) * sublane
            row_tile = min(row_tile, cap)
        row_tile = max(row_tile, sublane)
    n_row = pl.cdiv(packed_rows, row_tile)

    # --- Build the 2-D view.  k == 1: pure metadata reshape (no pad, no copy).
    #     k > 1: pad at most (k - 1) rows so rows fold evenly into packed rows;
    #     ragged grid edges are handled by Pallas masking, not padding.
    total = rows * dim
    padded_total = packed_rows * packed_dim
    if k == 1:
        x2d = x.reshape(packed_rows, packed_dim)
    else:
        x_flat = x.reshape(-1)
        if padded_total != total:
            x_flat = jnp.pad(x_flat, (0, padded_total - total))
        x2d = x_flat.reshape(packed_rows, packed_dim)

    gamma2d = jnp.tile(gamma.astype(compute_dtype), (k,)).reshape(1, packed_dim)

    block_bytes = row_tile * lane_tile * bytes_per_elem
    gamma_bytes = lane_tile * jnp.dtype(compute_dtype).itemsize
    vmem_limit = int(min(48 * 1024 * 1024,
                         max(16 * 1024 * 1024,
                             2 * block_bytes + 4 * gamma_bytes + (2 << 20))))

    out2d = pl.pallas_call(
        _layer_scale_kernel,
        out_shape=jax.ShapeDtypeStruct((packed_rows, packed_dim), out_dtype),
        grid_spec=pltpu.PrefetchScalarGridSpec(
            num_scalar_prefetch=0,
            grid=(n_row, n_lane),
            in_specs=[
                pl.BlockSpec((row_tile, lane_tile), lambda i, j: (i, j)),
                pl.BlockSpec((1, lane_tile), lambda i, j: (0, j)),  # gamma resident
            ],
            out_specs=pl.BlockSpec((row_tile, lane_tile), lambda i, j: (i, j)),
        ),
        compiler_params=pltpu.CompilerParams(
            dimension_semantics=("parallel", "parallel"),
            vmem_limit_bytes=vmem_limit,
        ),
    )(x2d, gamma2d)

    if k == 1:
        return out2d.reshape(orig_shape)
    out_flat = out2d.reshape(-1)
    if padded_total != total:
        out_flat = out_flat[:total]
    return out_flat.reshape(orig_shape)


if __name__ == "__main__":
    # Module config (deterministic init, matching nn.Parameter(init_values * ones(dim))).
    dim = 32
    init_values = 1e-05
    gamma = init_values * jnp.ones((dim,), dtype=jnp.float32)
    key = jax.random.PRNGKey(0)

    # Main example: tokens layout (batch=2, seq=8, hidden=32), fp32 (packing path, no pad).
    x = jax.random.normal(key, (2, 8, dim), dtype=jnp.float32)
    out = jax.block_until_ready(layer_scale(x, gamma))
    assert out.shape == x.shape and out.dtype == x.dtype
    assert jnp.allclose(out, x * gamma, atol=1e-6, rtol=1e-6)

    # dim < 128 with rows not a multiple of k (packing + minimal k-row pad path).
    dim2 = 96
    gamma2 = init_values * jnp.ones((dim2,), dtype=jnp.float32)
    x2 = jax.random.normal(jax.random.PRNGKey(0), (3, 5, dim2), dtype=jnp.float32)
    out2 = jax.block_until_ready(layer_scale(x2, gamma2))
    assert jnp.allclose(out2, x2 * gamma2, atol=1e-6, rtol=1e-6)

    # dim >= 128 but not a multiple of 128: direct path, no pad / no slice, masked lane tail.
    dim3 = 192
    gamma3 = init_values * jnp.ones((dim3,), dtype=jnp.float32)
    x3 = jax.random.normal(jax.random.PRNGKey(0), (2, 9, dim3), dtype=jnp.float32)
    out3 = jax.block_until_ready(layer_scale(x3, gamma3))
    assert jnp.allclose(out3, x3 * gamma3, atol=1e-6, rtol=1e-6)

    # dim a multiple of 128: pure-metadata reshape, zero extra HBM passes.
    dim4 = 256
    gamma4 = init_values * jnp.ones((dim4,), dtype=jnp.float32)
    x4 = jax.random.normal(jax.random.PRNGKey(0), (2, 16, dim4), dtype=jnp.float32)
    out4 = jax.block_until_ready(layer_scale(x4, gamma4))
    assert jnp.allclose(out4, x4 * gamma4, atol=1e-6, rtol=1e-6)

    # bf16 activations + fp32 gamma: default keeps strict PyTorch promotion (fp32 out).
    x5 = jax.random.normal(jax.random.PRNGKey(0), (2, 8, dim), dtype=jnp.bfloat16)
    out5 = jax.block_until_ready(layer_scale(x5, gamma))
    ref5 = x5 * gamma
    assert out5.dtype == ref5.dtype
    assert jnp.allclose(out5, ref5, atol=1e-6, rtol=1e-6)

    # bf16 activations + fp32 gamma with explicit bf16 output (halves write bytes).
    out6 = jax.block_until_ready(layer_scale(x5, gamma, out_dtype=jnp.bfloat16))
    ref6 = (x5.astype(jnp.float32) * gamma).astype(jnp.bfloat16)
    assert out6.dtype == jnp.bfloat16
    assert jnp.allclose(out6.astype(jnp.float32), ref6.astype(jnp.float32),
                        atol=1e-6, rtol=1e-6)

    # All-bf16: kernel computes natively in bf16 (no fp32 round-trip).
    gamma_bf16 = gamma.astype(jnp.bfloat16)
    out7 = jax.block_until_ready(layer_scale(x5, gamma_bf16))
    assert out7.dtype == jnp.bfloat16
    assert jnp.allclose(out7.astype(jnp.float32), (x5 * gamma_bf16).astype(jnp.float32),
                        atol=1e-2, rtol=1e-2)

    # TODO(synk): the PyTorch inplace=True variant mutates x; JAX arrays are
    # immutable, so only the (identical) forward value is produced here.
    print("KERNEL_OK")
</pallas_src>

<mosaic_0001>
module attributes {stable_mosaic.version = 11 : i64} {
  func.func @_layer_scale_kernel(%arg0: i32, %arg1: i32, %arg2: memref<4x128xf32, #tpu.memory_space<vmem>>, %arg3: memref<1x128xf32, #tpu.memory_space<vmem>>, %arg4: memref<4x128xf32, #tpu.memory_space<vmem>>) attributes {dimension_semantics = [#tpu.dimension_semantics<parallel>, #tpu.dimension_semantics<parallel>], iteration_bounds = array<i64: 1, 1>, scalar_prefetch = 0 : i64, scratch_operands = 0 : i64, tpu.core_type = #tpu.core_type<tc>, window_params = [{transform_indices = @transform_0, window_bounds = array<i64: 4, 128>}, {transform_indices = @transform_1, window_bounds = array<i64: 1, 128>}, {transform_indices = @transform_2, window_bounds = array<i64: 4, 128>}]} {
    %c0 = arith.constant 0 : index
    %c0_0 = arith.constant 0 : index
    %0 = vector.load %arg3[%c0, %c0_0] : memref<1x128xf32, #tpu.memory_space<vmem>>, vector<1x128xf32>
    %c0_1 = arith.constant 0 : index
    %c0_2 = arith.constant 0 : index
    %1 = vector.load %arg2[%c0_1, %c0_2] : memref<4x128xf32, #tpu.memory_space<vmem>>, vector<4x128xf32>
    %2 = vector.broadcast %0 : vector<1x128xf32> to vector<4x128xf32>
    %3 = arith.mulf %1, %2 : vector<4x128xf32>
    %c0_3 = arith.constant 0 : index
    %c0_4 = arith.constant 0 : index
    %4 = vector.load %arg4[%c0_3, %c0_4] : memref<4x128xf32, #tpu.memory_space<vmem>>, vector<4x128xf32>
    tpu.vector_store %arg4[%c0_3, %c0_4], %3 {strides = array<i32>} : memref<4x128xf32, #tpu.memory_space<vmem>>, vector<4x128xf32>,
    return
  }
  func.func @transform_0(%arg0: i32, %arg1: i32) -> (i32, i32) {
    %c0_i32 = arith.constant 0 : i32
    return %arg0, %arg1 : i32, i32
  }
  func.func @transform_1(%arg0: i32, %arg1: i32) -> (i32, i32) {
    %c0_i32 = arith.constant 0 : i32
    %c0_i32_0 = arith.constant 0 : i32
    return %c0_i32, %arg1 : i32, i32
  }
  func.func @transform_2(%arg0: i32, %arg1: i32) -> (i32, i32) {
    %c0_i32 = arith.constant 0 : i32
    return %arg0, %arg1 : i32, i32
  }
}

</mosaic_0001>

<bundles_post_ra>
// kernel: tpu_custom_call.1
= control target key start
LH: loop header
LB: loop body
LE: loop exit
PB: predicated region body
PF: predicated region fallthrough
CT: control target
= control target key end

     0   :  { %7 = vsyncpa [#allocation3], 0  ;;  %s174_s0 = inlined_call_operand.hbm [shape: f32[4,128], index: 0, kind: input, shape index: {}]   ;;  %s175_s1 = inlined_call_operand.hbm [shape: f32[1,128], index: 1, kind: input, shape index: {}]   ;;  %s176_s2 = inlined_call_operand.hbm [shape: f32[4,128], index: 2, kind: output, shape index: {}]  }
   0x1   :  { %8 = vsyncpa [#allocation6], 0 }
   0x2   :  { %9 = vsyncpa [#allocation4], 0  ;;  %s15_s11 = sshll.u32 %s174_s0, 4  ;;  %s147_s12 = smov [#allocation2]   ;;  %s16_s11 = int_to_ptr.hbm [resolvable:$true] %s15_s11 }
   0x3   :  { %s17_s13 = sshll.u32 %s147_s12, 4  ;;  %s26_s16 = sshll.u32 %s175_s1, 4  ;;  %s18_s13 = int_to_ptr.vmem [resolvable:$true] %s17_s13  ;;  %s27_s16 = int_to_ptr.hbm [resolvable:$true] %s26_s16 }
   0x4   :  { %20 = dma.hbm_to_vmem [thread:$0]  %s16_s11, 64, %s18_s13, [#allocation3]  }
   0x5   :  { %s148_s17 = smov [#allocation5]  }
   0x6   :  { %s28_s18 = sshll.u32 %s148_s17, 4  ;;  %s29_s18 = int_to_ptr.vmem [resolvable:$true] %s28_s18 }
   0x7   :  { %31 = dma.hbm_to_vmem [thread:$0]  %s27_s16, 16, %s29_s18, [#allocation6]  }
   0x8   :  { %141 = dma.done.wait [#allocation3], 64  }
   0x9   :  { %142 = vsyncadd [#allocation3], 4294967232 }
   0xa   :  { %143 = dma.done.wait [#allocation6], 16  }
   0xb   :  { %144 = vsyncadd [#allocation6], 4294967280  ;;  %s149_s19 = smov [#allocation7]   ;;  %s54_s22 = sshll.u32 %s176_s2, 4  ;;  %v41_v0 = vld [vmem:[#allocation2] sm:$0xf]  ;;  %s55_s22 = int_to_ptr.hbm [resolvable:$true] %s54_s22 }
   0xc   :  { %s52_s0 = sshll.u32 %s149_s19, 4  ;;  %v68_v1 = vld [vmem:[#allocation5] ss:$0 sm:$0xff]  ;;  %s53_s0 = int_to_ptr.vmem [resolvable:$true] %s52_s0 }
   0xd   :  { %v45_v2 = vmul.f32 %v68_v1, %v41_v0 }
   0xf   :  { %46 = vst [vmem:[#allocation7] sm:$0xf] %v45_v2 }
  0x10   :  { %57 = dma.vmem_to_hbm [thread:$0]  %s53_s0, 64, %s55_s22, [#allocation4]  }
  0x11   :  { %145 = dma.done.wait [#allocation4], 64  }
  0x12   :  { %146 = vsyncadd [#allocation4], 4294967232 }
  0x13   :  { %62 = vsyncpa [#allocation3], 1 }
  0x14   :  { %63 = vsyncpa [#allocation6], 1 }
  0x15   :  { %64 = vsyncpa [#allocation4], 1 }

</bundles_post_ra>
